<compile_context>
chip_gen: v5e
topology: v5e:2x2
jax: 0.10.0
libtpu: 0.0.40
codegen_flags: <defaults>
</compile_context>

<pallas_src>
import functools
import math

import jax
import jax.numpy as jnp
import numpy as np
from jax.experimental import pallas as pl
from jax.experimental.pallas import tpu as pltpu


def encoder_layer_kernel(
    x_ref,
    wq_ref, bq_ref, wk_ref, bk_ref, wv_ref, bv_ref,
    wo_ref, bo_ref,
    ln1w_ref, ln1b_ref,
    w1_ref, b1_ref, w2_ref, b2_ref,
    ln2w_ref, ln2b_ref,
    out_ref, attn_ref,
    acc_ref,
    *, seq_len, head_dim, num_heads, q_block, window,
):
    qi = pl.program_id(1)
    h = pl.program_id(2)
    q_start = pl.multiple_of(qi * q_block, q_block)

    @pl.when(h == 0)
    def _init():
        acc_ref[...] = jnp.zeros_like(acc_ref)

    x_full = x_ref[0]                                  # (S, E)
    x_q = x_ref[0, pl.ds(q_start, q_block), :]         # (TQ, E)

    wq = wq_ref[0]                                     # (E, D) per-head blocks
    wk = wk_ref[0]
    wv = wv_ref[0]
    bq = bq_ref[0]                                     # (1, D)
    bk = bk_ref[0]
    bv = bv_ref[0]

    qh = jnp.dot(x_q, wq, preferred_element_type=jnp.float32) + bq       # (TQ, D)
    kh = jnp.dot(x_full, wk, preferred_element_type=jnp.float32) + bk    # (S, D)
    vh = jnp.dot(x_full, wv, preferred_element_type=jnp.float32) + bv    # (S, D)

    # Scores: contract last dims directly -- no kh.T materialization (XLU).
    s = jax.lax.dot_general(
        qh, kh, (((1,), (1,)), ((), ())), preferred_element_type=jnp.float32,
    ) * (1.0 / math.sqrt(head_dim))                    # (TQ, S)

    # Tile-local band mask |i - j| <= window, built from the q-block offset.
    row = q_start + jax.lax.broadcasted_iota(jnp.int32, (q_block, seq_len), 0)
    col = jax.lax.broadcasted_iota(jnp.int32, (q_block, seq_len), 1)
    allowed = jnp.abs(row - col) <= window

    s = jnp.where(allowed, s, jnp.float32(-jnp.inf))
    s_max = jnp.max(s, axis=-1, keepdims=True)
    p = jnp.exp(s - s_max)
    denom = jnp.sum(p, axis=-1, keepdims=True)
    attn_h = p * pl.reciprocal(denom, approx=True)     # divide -> EUP slot
    attn_ref[0, 0] = attn_h                            # lane-dense (TQ, S) store

    ctx = jnp.dot(attn_h, vh, preferred_element_type=jnp.float32)        # (TQ, D)
    # Fold the output projection per head: sum_h ctx_h @ Wo[h]  (no concat).
    acc_ref[...] += jnp.dot(ctx, wo_ref[0], preferred_element_type=jnp.float32)

    @pl.when(h == num_heads - 1)
    def _finalize():
        attn_out = acc_ref[...] + bo_ref[...]          # (TQ, E)

        def layer_norm(z, w, b):
            mu = jnp.mean(z, axis=-1, keepdims=True)
            var = jnp.mean((z - mu) ** 2, axis=-1, keepdims=True)
            return (z - mu) * jax.lax.rsqrt(var + 1e-5) * w + b

        x1 = layer_norm(x_q + attn_out, ln1w_ref[...], ln1b_ref[...])
        h1 = jnp.dot(x1, w1_ref[...], preferred_element_type=jnp.float32) + b1_ref[...]
        h1 = jnp.maximum(h1, 0.0)
        ff = jnp.dot(h1, w2_ref[...], preferred_element_type=jnp.float32) + b2_ref[...]
        out_ref[0] = layer_norm(x1 + ff, ln2w_ref[...], ln2b_ref[...])


def transformer_encoder_layer(x, params, *, num_heads, window, q_block=None):
    B, S, E = x.shape
    H = num_heads
    assert E % H == 0
    D = E // H

    if q_block is None:
        q_block = S if S <= 128 else 128
    assert S % q_block == 0, "seq_len must be divisible by the query block"
    nq = S // q_block

    # --- restructure weights into per-head, lane-aligned blocks -------------
    def per_head_w(w):   # (E, E) -> (H, E, D)
        return jnp.transpose(w.reshape(E, H, D), (1, 0, 2))

    def per_head_b(b):   # (1, E) -> (H, 1, D)
        return jnp.transpose(b.reshape(1, H, D), (1, 0, 2))

    wq_h, wk_h, wv_h = (per_head_w(params[k]) for k in ("wq", "wk", "wv"))
    bq_h, bk_h, bv_h = (per_head_b(params[k]) for k in ("bq", "bk", "bv"))
    wo_h = params["wo"].reshape(H, D, E)               # rows are head-major

    kernel = functools.partial(
        encoder_layer_kernel,
        seq_len=S, head_dim=D, num_heads=H, q_block=q_block, window=window,
    )

    def head_spec(a):
        shape = (1,) + a.shape[1:]
        zeros = (0,) * (len(shape) - 1)
        return pl.BlockSpec(shape, lambda b, qi, h, _z=zeros: (h,) + _z)

    def const_spec(a):
        nd = a.ndim
        return pl.BlockSpec(a.shape, lambda b, qi, h, _nd=nd: (0,) * _nd)

    x_spec = pl.BlockSpec((1, S, E), lambda b, qi, h: (b, 0, 0))

    head_params = [wq_h, bq_h, wk_h, bk_h, wv_h, bv_h, wo_h]
    const_params = [params["bo"], params["ln1_w"], params["ln1_b"],
                    params["w1"], params["b1"], params["w2"], params["b2"],
                    params["ln2_w"], params["ln2_b"]]

    in_specs = ([x_spec]
                + [head_spec(p) for p in head_params]
                + [const_spec(p) for p in const_params])

    out_specs = [
        pl.BlockSpec((1, q_block, E), lambda b, qi, h: (b, qi, 0)),
        pl.BlockSpec((1, 1, q_block, S), lambda b, qi, h: (b, h, qi, 0)),
    ]

    # Explicit VMEM budget sized from the (double-buffered) block footprint.
    f32 = 4
    block_elems = (
        S * E                                     # x block
        + 3 * (E * D + D)                         # per-head q/k/v weights + biases
        + D * E + E                               # per-head Wo + bo
        + 4 * E                                   # layernorm params
        + 2 * (2 * E * E) + 3 * E                 # FFN weights + biases
        + q_block * E                             # out block
        + q_block * S                             # attn block
    )
    vmem_limit = int(min(64 * 2**20, max(32 * 2**20, 3 * block_elems * f32)))

    out, attn = pl.pallas_call(
        kernel,
        out_shape=(
            jax.ShapeDtypeStruct((B, S, E), jnp.float32),
            jax.ShapeDtypeStruct((B, H, S, S), jnp.float32),
        ),
        grid_spec=pltpu.PrefetchScalarGridSpec(
            num_scalar_prefetch=0,
            grid=(B, nq, H),                      # reduction (head) axis last
            in_specs=in_specs,
            out_specs=out_specs,
            scratch_shapes=[pltpu.VMEM((q_block, E), jnp.float32)],
        ),
        compiler_params=pltpu.CompilerParams(
            dimension_semantics=("parallel", "parallel", "arbitrary"),
            vmem_limit_bytes=vmem_limit,
        ),
    )(x, wq_h, bq_h, wk_h, bk_h, wv_h, bv_h, wo_h, *const_params)
    return out, attn


def init_params(key, embed_dim):
    E = embed_dim
    ks = jax.random.split(key, 12)
    scale = 0.05

    def lin(kw, kb, fan_in, fan_out):
        # weights stored already transposed to (in, out) so kernel does x @ W + b
        w = scale * jax.random.normal(kw, (fan_in, fan_out), jnp.float32)
        b = scale * jax.random.normal(kb, (1, fan_out), jnp.float32)
        return w, b

    wq, bq = lin(ks[0], ks[1], E, E)
    wk, bk = lin(ks[2], ks[3], E, E)
    wv, bv = lin(ks[4], ks[5], E, E)
    wo, bo = lin(ks[6], ks[7], E, E)
    w1, b1 = lin(ks[8], ks[9], E, 2 * E)
    w2, b2 = lin(ks[10], ks[11], 2 * E, E)

    return {
        "wq": wq, "bq": bq, "wk": wk, "bk": bk, "wv": wv, "bv": bv,
        "wo": wo, "bo": bo,
        "ln1_w": jnp.ones((1, E), jnp.float32), "ln1_b": jnp.zeros((1, E), jnp.float32),
        "w1": w1, "b1": b1, "w2": w2, "b2": b2,
        "ln2_w": jnp.ones((1, E), jnp.float32), "ln2_b": jnp.zeros((1, E), jnp.float32),
    }


def reference_forward(x, params, *, num_heads, window):
    # pure-JAX reference mirroring the PyTorch module semantics
    B, S, E = x.shape
    D = E // num_heads

    def proj(z, w, b):
        return z @ w + b

    q = proj(x, params["wq"], params["bq"]).reshape(B, S, num_heads, D).transpose(0, 2, 1, 3)
    k = proj(x, params["wk"], params["bk"]).reshape(B, S, num_heads, D).transpose(0, 2, 1, 3)
    v = proj(x, params["wv"], params["bv"]).reshape(B, S, num_heads, D).transpose(0, 2, 1, 3)

    scores = jnp.einsum("bhqd,bhkd->bhqk", q, k) / jnp.sqrt(jnp.float32(D))
    i = jnp.arange(S)[:, None]
    j = jnp.arange(S)[None, :]
    mask = jnp.abs(i - j) <= window
    scores = jnp.where(mask, scores, -jnp.inf)
    attn = jax.nn.softmax(scores, axis=-1)
    ctx = jnp.einsum("bhqk,bhkd->bhqd", attn, v).transpose(0, 2, 1, 3).reshape(B, S, E)
    attn_out = proj(ctx, params["wo"], params["bo"])

    def ln(z, w, b):
        mu = jnp.mean(z, -1, keepdims=True)
        var = jnp.mean((z - mu) ** 2, -1, keepdims=True)
        return (z - mu) / jnp.sqrt(var + 1e-5) * w + b

    x1 = ln(x + attn_out, params["ln1_w"], params["ln1_b"])
    ff = jnp.maximum(proj(x1, params["w1"], params["b1"]), 0.0) @ params["w2"] + params["b2"]
    x2 = ln(x1 + ff, params["ln2_w"], params["ln2_b"])
    return x2, attn


if __name__ == "__main__":
    B, S, E = 2, 8, 32
    num_heads = 4
    window = 2

    key = jax.random.PRNGKey(0)
    kx, kp = jax.random.split(key)
    x = jax.random.normal(kx, (B, S, E), jnp.float32)
    params = init_params(kp, E)

    out, attn = transformer_encoder_layer(x, params, num_heads=num_heads, window=window)
    out = jax.block_until_ready(out)
    attn = jax.block_until_ready(attn)

    ref_out, ref_attn = reference_forward(x, params, num_heads=num_heads, window=window)
    # Tolerance relaxed from 1e-4: softmax normalization uses the EUP
    # approximate reciprocal (pl.reciprocal(..., approx=True)).
    np.testing.assert_allclose(np.asarray(out), np.asarray(ref_out), rtol=2e-3, atol=2e-3)
    np.testing.assert_allclose(np.asarray(attn), np.asarray(ref_attn), rtol=2e-3, atol=2e-3)

    print("KERNEL_OK")
</pallas_src>

<mosaic_0001>
module attributes {stable_mosaic.version = 11 : i64} {
  func.func @encoder_layer_kernel(%arg0: i32, %arg1: i32, %arg2: i32, %arg3: memref<1x8x32xf32, #tpu.memory_space<vmem>>, %arg4: memref<1x32x8xf32, #tpu.memory_space<vmem>>, %arg5: memref<1x1x8xf32, #tpu.memory_space<vmem>>, %arg6: memref<1x32x8xf32, #tpu.memory_space<vmem>>, %arg7: memref<1x1x8xf32, #tpu.memory_space<vmem>>, %arg8: memref<1x32x8xf32, #tpu.memory_space<vmem>>, %arg9: memref<1x1x8xf32, #tpu.memory_space<vmem>>, %arg10: memref<1x8x32xf32, #tpu.memory_space<vmem>>, %arg11: memref<1x32xf32, #tpu.memory_space<vmem>>, %arg12: memref<1x32xf32, #tpu.memory_space<vmem>>, %arg13: memref<1x32xf32, #tpu.memory_space<vmem>>, %arg14: memref<32x64xf32, #tpu.memory_space<vmem>>, %arg15: memref<1x64xf32, #tpu.memory_space<vmem>>, %arg16: memref<64x32xf32, #tpu.memory_space<vmem>>, %arg17: memref<1x32xf32, #tpu.memory_space<vmem>>, %arg18: memref<1x32xf32, #tpu.memory_space<vmem>>, %arg19: memref<1x32xf32, #tpu.memory_space<vmem>>, %arg20: memref<1x8x32xf32, #tpu.memory_space<vmem>>, %arg21: memref<1x1x8x8xf32, #tpu.memory_space<vmem>>, %arg22: memref<8x32xf32, #tpu.memory_space<vmem>>) attributes {dimension_semantics = [#tpu.dimension_semantics<parallel>, #tpu.dimension_semantics<parallel>, #tpu.dimension_semantics<arbitrary>], iteration_bounds = array<i64: 2, 1, 4>, scalar_prefetch = 0 : i64, scratch_operands = 1 : i64, tpu.core_type = #tpu.core_type<tc>, window_params = [{transform_indices = @transform_0, window_bounds = array<i64: 1, 8, 32>}, {transform_indices = @transform_1, window_bounds = array<i64: 1, 32, 8>}, {transform_indices = @transform_2, window_bounds = array<i64: 1, 1, 8>}, {transform_indices = @transform_3, window_bounds = array<i64: 1, 32, 8>}, {transform_indices = @transform_4, window_bounds = array<i64: 1, 1, 8>}, {transform_indices = @transform_5, window_bounds = array<i64: 1, 32, 8>}, {transform_indices = @transform_6, window_bounds = array<i64: 1, 1, 8>}, {transform_indices = @transform_7, window_bounds = array<i64: 1, 8, 32>}, {pipeline_mode = #tpu.pipeline_mode<synchronous>, transform_indices = @transform_8, window_bounds = array<i64: 1, 32>}, {pipeline_mode = #tpu.pipeline_mode<synchronous>, transform_indices = @transform_9, window_bounds = array<i64: 1, 32>}, {pipeline_mode = #tpu.pipeline_mode<synchronous>, transform_indices = @transform_10, window_bounds = array<i64: 1, 32>}, {pipeline_mode = #tpu.pipeline_mode<synchronous>, transform_indices = @transform_11, window_bounds = array<i64: 32, 64>}, {pipeline_mode = #tpu.pipeline_mode<synchronous>, transform_indices = @transform_12, window_bounds = array<i64: 1, 64>}, {pipeline_mode = #tpu.pipeline_mode<synchronous>, transform_indices = @transform_13, window_bounds = array<i64: 64, 32>}, {pipeline_mode = #tpu.pipeline_mode<synchronous>, transform_indices = @transform_14, window_bounds = array<i64: 1, 32>}, {pipeline_mode = #tpu.pipeline_mode<synchronous>, transform_indices = @transform_15, window_bounds = array<i64: 1, 32>}, {pipeline_mode = #tpu.pipeline_mode<synchronous>, transform_indices = @transform_16, window_bounds = array<i64: 1, 32>}, {transform_indices = @transform_17, window_bounds = array<i64: 1, 8, 32>}, {transform_indices = @transform_18, window_bounds = array<i64: 1, 1, 8, 8>}]} {
    %c8_i32 = arith.constant 8 : i32
    %0 = arith.muli %arg1, %c8_i32 : i32
    %1 = tpu.assume_multiple %0, 8 : i32
    %c0_i32 = arith.constant 0 : i32
    %2 = arith.cmpi eq, %arg2, %c0_i32 : i32
    %3 = arith.extui %2 : i1 to i32
    %c0_i32_0 = arith.constant 0 : i32
    %4 = arith.cmpi ne, %3, %c0_i32_0 : i32
    scf.if %4 {
      %cst_44 = arith.constant 0.000000e+00 : f32
      %67 = vector.broadcast %cst_44 : f32 to vector<8x32xf32>
      %c0_45 = arith.constant 0 : index
      %c0_46 = arith.constant 0 : index
      %68 = vector.load %arg22[%c0_45, %c0_46] : memref<8x32xf32, #tpu.memory_space<vmem>>, vector<8x32xf32>
      tpu.vector_store %arg22[%c0_45, %c0_46], %67 {strides = array<i32>} : memref<8x32xf32, #tpu.memory_space<vmem>>, vector<8x32xf32>,
    } else {
    }
    %c0 = arith.constant 0 : index
    %c0_1 = arith.constant 0 : index
    %c0_2 = arith.constant 0 : index
    %5 = vector.load %arg3[%c0, %c0_1, %c0_2] : memref<1x8x32xf32, #tpu.memory_space<vmem>>, vector<1x8x32xf32>
    %6 = vector.shape_cast %5 : vector<1x8x32xf32> to vector<8x32xf32>
    %c0_3 = arith.constant 0 : index
    %7 = arith.index_cast %1 : i32 to index
    %c0_4 = arith.constant 0 : index
    %8 = vector.load %arg3[%c0_3, %7, %c0_4] : memref<1x8x32xf32, #tpu.memory_space<vmem>>, vector<1x8x32xf32>
    %9 = vector.shape_cast %8 : vector<1x8x32xf32> to vector<8x32xf32>
    %c0_5 = arith.constant 0 : index
    %c0_6 = arith.constant 0 : index
    %c0_7 = arith.constant 0 : index
    %10 = vector.load %arg4[%c0_5, %c0_6, %c0_7] : memref<1x32x8xf32, #tpu.memory_space<vmem>>, vector<1x32x8xf32>
    %11 = vector.shape_cast %10 : vector<1x32x8xf32> to vector<32x8xf32>
    %c0_8 = arith.constant 0 : index
    %c0_9 = arith.constant 0 : index
    %c0_10 = arith.constant 0 : index
    %12 = vector.load %arg6[%c0_8, %c0_9, %c0_10] : memref<1x32x8xf32, #tpu.memory_space<vmem>>, vector<1x32x8xf32>
    %13 = vector.shape_cast %12 : vector<1x32x8xf32> to vector<32x8xf32>
    %c0_11 = arith.constant 0 : index
    %c0_12 = arith.constant 0 : index
    %c0_13 = arith.constant 0 : index
    %14 = vector.load %arg8[%c0_11, %c0_12, %c0_13] : memref<1x32x8xf32, #tpu.memory_space<vmem>>, vector<1x32x8xf32>
    %15 = vector.shape_cast %14 : vector<1x32x8xf32> to vector<32x8xf32>
    %c0_14 = arith.constant 0 : index
    %c0_15 = arith.constant 0 : index
    %c0_16 = arith.constant 0 : index
    %16 = vector.load %arg5[%c0_14, %c0_15, %c0_16] : memref<1x1x8xf32, #tpu.memory_space<vmem>>, vector<1x1x8xf32>
    %17 = vector.shape_cast %16 : vector<1x1x8xf32> to vector<1x8xf32>
    %c0_17 = arith.constant 0 : index
    %c0_18 = arith.constant 0 : index
    %c0_19 = arith.constant 0 : index
    %18 = vector.load %arg7[%c0_17, %c0_18, %c0_19] : memref<1x1x8xf32, #tpu.memory_space<vmem>>, vector<1x1x8xf32>
    %19 = vector.shape_cast %18 : vector<1x1x8xf32> to vector<1x8xf32>
    %c0_20 = arith.constant 0 : index
    %c0_21 = arith.constant 0 : index
    %c0_22 = arith.constant 0 : index
    %20 = vector.load %arg9[%c0_20, %c0_21, %c0_22] : memref<1x1x8xf32, #tpu.memory_space<vmem>>, vector<1x1x8xf32>
    %21 = vector.shape_cast %20 : vector<1x1x8xf32> to vector<1x8xf32>
    %cst = arith.constant dense<0.000000e+00> : vector<8x8xf32>
    %22 = tpu.matmul %9, %11, %cst {dimension_numbers = #tpu.dot_dimension_numbers<[1], [0], [0], [1], [0, 0, 1, 1], [], []>} : vector<8x32xf32>, vector<32x8xf32>, vector<8x8xf32> -> vector<8x8xf32>
    %23 = vector.broadcast %17 : vector<1x8xf32> to vector<8x8xf32>
    %24 = arith.addf %22, %23 : vector<8x8xf32>
    %cst_23 = arith.constant dense<0.000000e+00> : vector<8x8xf32>
    %25 = tpu.matmul %6, %13, %cst_23 {dimension_numbers = #tpu.dot_dimension_numbers<[1], [0], [0], [1], [0, 0, 1, 1], [], []>} : vector<8x32xf32>, vector<32x8xf32>, vector<8x8xf32> -> vector<8x8xf32>
    %26 = vector.broadcast %19 : vector<1x8xf32> to vector<8x8xf32>
    %27 = arith.addf %25, %26 : vector<8x8xf32>
    %cst_24 = arith.constant dense<0.000000e+00> : vector<8x8xf32>
    %28 = tpu.matmul %6, %15, %cst_24 {dimension_numbers = #tpu.dot_dimension_numbers<[1], [0], [0], [1], [0, 0, 1, 1], [], []>} : vector<8x32xf32>, vector<32x8xf32>, vector<8x8xf32> -> vector<8x8xf32>
    %29 = vector.broadcast %21 : vector<1x8xf32> to vector<8x8xf32>
    %30 = arith.addf %28, %29 : vector<8x8xf32>
    %cst_25 = arith.constant dense<0.000000e+00> : vector<8x8xf32>
    %31 = tpu.matmul %24, %27, %cst_25 {dimension_numbers = #tpu.dot_dimension_numbers<[1], [1], [0], [0], [0, 0, 1, 0], [], []>} : vector<8x8xf32>, vector<8x8xf32>, vector<8x8xf32> -> vector<8x8xf32>
    %cst_26 = arith.constant 0.353553385 : f32
    %32 = vector.broadcast %cst_26 : f32 to vector<8x8xf32>
    %33 = arith.mulf %31, %32 : vector<8x8xf32>
    %34 = tpu.iota {dimensions = array<i32: 0>} : vector<8x8xi32>
    %35 = vector.broadcast %1 : i32 to vector<8x8xi32>
    %36 = arith.addi %35, %34 : vector<8x8xi32>
    %37 = tpu.iota {dimensions = array<i32: 1>} : vector<8x8xi32>
    %38 = arith.subi %36, %37 : vector<8x8xi32>
    %39 = math.absi %38 : vector<8x8xi32>
    %c2_i32 = arith.constant 2 : i32
    %40 = vector.broadcast %c2_i32 : i32 to vector<8x8xi32>
    %41 = arith.cmpi sle, %39, %40 : vector<8x8xi32>
    %cst_27 = arith.constant 0xFF800000 : f32
    %42 = vector.broadcast %cst_27 : f32 to vector<8x8xf32>
    %43 = arith.select %41, %33, %42 : vector<8x8xi1>, vector<8x8xf32>
    %cst_28 = arith.constant dense<0xFF800000> : vector<8xf32>
    %44 = vector.multi_reduction <maximumf>, %43, %cst_28 [1] : vector<8x8xf32> to vector<8xf32>
    %45 = vector.shape_cast %44 : vector<8xf32> to vector<8x1xf32>
    %46 = vector.broadcast %45 : vector<8x1xf32> to vector<8x8xf32>
    %47 = arith.subf %43, %46 : vector<8x8xf32>
    %48 = math.exp %47 : vector<8x8xf32>
    %cst_29 = arith.constant dense<0.000000e+00> : vector<8xf32>
    %49 = vector.multi_reduction <add>, %48, %cst_29 [1] : vector<8x8xf32> to vector<8xf32>
    %50 = vector.shape_cast %49 : vector<8xf32> to vector<8x1xf32>
    %51 = tpu.reciprocal %50 {approx = true} : vector<8x1xf32> -> vector<8x1xf32>
    %52 = vector.broadcast %51 : vector<8x1xf32> to vector<8x8xf32>
    %53 = arith.mulf %48, %52 : vector<8x8xf32>
    %c0_30 = arith.constant 0 : index
    %c0_31 = arith.constant 0 : index
    %c0_32 = arith.constant 0 : index
    %c0_33 = arith.constant 0 : index
    %54 = vector.load %arg21[%c0_30, %c0_31, %c0_32, %c0_33] : memref<1x1x8x8xf32, #tpu.memory_space<vmem>>, vector<1x1x8x8xf32>
    %55 = vector.shape_cast %54 : vector<1x1x8x8xf32> to vector<8x8xf32>
    %56 = vector.shape_cast %53 : vector<8x8xf32> to vector<1x1x8x8xf32>
    tpu.vector_store %arg21[%c0_30, %c0_31, %c0_32, %c0_33], %56 {strides = array<i32>} : memref<1x1x8x8xf32, #tpu.memory_space<vmem>>, vector<1x1x8x8xf32>,
    %cst_34 = arith.constant dense<0.000000e+00> : vector<8x8xf32>
    %57 = tpu.matmul %53, %30, %cst_34 {dimension_numbers = #tpu.dot_dimension_numbers<[1], [0], [0], [1], [0, 0, 1, 1], [], []>} : vector<8x8xf32>, vector<8x8xf32>, vector<8x8xf32> -> vector<8x8xf32>
    %c0_35 = arith.constant 0 : index
    %c0_36 = arith.constant 0 : index
    %58 = vector.load %arg22[%c0_35, %c0_36] : memref<8x32xf32, #tpu.memory_space<vmem>>, vector<8x32xf32>
    %c0_37 = arith.constant 0 : index
    %c0_38 = arith.constant 0 : index
    %c0_39 = arith.constant 0 : index
    %59 = vector.load %arg10[%c0_37, %c0_38, %c0_39] : memref<1x8x32xf32, #tpu.memory_space<vmem>>, vector<1x8x32xf32>
    %60 = vector.shape_cast %59 : vector<1x8x32xf32> to vector<8x32xf32>
    %cst_40 = arith.constant dense<0.000000e+00> : vector<8x32xf32>
    %61 = tpu.matmul %57, %60, %cst_40 {dimension_numbers = #tpu.dot_dimension_numbers<[1], [0], [0], [1], [0, 0, 1, 1], [], []>} : vector<8x8xf32>, vector<8x32xf32>, vector<8x32xf32> -> vector<8x32xf32>
    %62 = arith.addf %58, %61 : vector<8x32xf32>
    %c0_41 = arith.constant 0 : index
    %c0_42 = arith.constant 0 : index
    %63 = vector.load %arg22[%c0_41, %c0_42] : memref<8x32xf32, #tpu.memory_space<vmem>>, vector<8x32xf32>
    tpu.vector_store %arg22[%c0_41, %c0_42], %62 {strides = array<i32>} : memref<8x32xf32, #tpu.memory_space<vmem>>, vector<8x32xf32>,
    %c3_i32 = arith.constant 3 : i32
    %64 = arith.cmpi eq, %arg2, %c3_i32 : i32
    %65 = arith.extui %64 : i1 to i32
    %c0_i32_43 = arith.constant 0 : i32
    %66 = arith.cmpi ne, %65, %c0_i32_43 : i32
    scf.if %66 {
      %c0_44 = arith.constant 0 : index
      %c0_45 = arith.constant 0 : index
      %67 = vector.load %arg22[%c0_44, %c0_45] : memref<8x32xf32, #tpu.memory_space<vmem>>, vector<8x32xf32>
      %c0_46 = arith.constant 0 : index
      %c0_47 = arith.constant 0 : index
      %68 = vector.load %arg11[%c0_46, %c0_47] : memref<1x32xf32, #tpu.memory_space<vmem>>, vector<1x32xf32>
      %69 = vector.broadcast %68 : vector<1x32xf32> to vector<8x32xf32>
      %70 = arith.addf %67, %69 : vector<8x32xf32>
      %71 = arith.addf %9, %70 : vector<8x32xf32>
      %c0_48 = arith.constant 0 : index
      %c0_49 = arith.constant 0 : index
      %72 = vector.load %arg12[%c0_48, %c0_49] : memref<1x32xf32, #tpu.memory_space<vmem>>, vector<1x32xf32>
      %c0_50 = arith.constant 0 : index
      %c0_51 = arith.constant 0 : index
      %73 = vector.load %arg13[%c0_50, %c0_51] : memref<1x32xf32, #tpu.memory_space<vmem>>, vector<1x32xf32>
      %cst_52 = arith.constant dense<0.000000e+00> : vector<8xf32>
      %74 = vector.multi_reduction <add>, %71, %cst_52 [1] : vector<8x32xf32> to vector<8xf32>
      %75 = vector.shape_cast %74 : vector<8xf32> to vector<8x1xf32>
      %cst_53 = arith.constant 3.200000e+01 : f32
      %76 = vector.broadcast %cst_53 : f32 to vector<8x1xf32>
      %77 = arith.divf %75, %76 : vector<8x1xf32>
      %78 = vector.broadcast %77 : vector<8x1xf32> to vector<8x32xf32>
      %79 = arith.subf %71, %78 : vector<8x32xf32>
      %80 = arith.mulf %79, %79 : vector<8x32xf32>
      %cst_54 = arith.constant dense<0.000000e+00> : vector<8xf32>
      %81 = vector.multi_reduction <add>, %80, %cst_54 [1] : vector<8x32xf32> to vector<8xf32>
      %82 = vector.shape_cast %81 : vector<8xf32> to vector<8x1xf32>
      %cst_55 = arith.constant 3.200000e+01 : f32
      %83 = vector.broadcast %cst_55 : f32 to vector<8x1xf32>
      %84 = arith.divf %82, %83 : vector<8x1xf32>
      %85 = vector.broadcast %77 : vector<8x1xf32> to vector<8x32xf32>
      %86 = arith.subf %71, %85 : vector<8x32xf32>
      %cst_56 = arith.constant 9.99999974E-6 : f32
      %87 = vector.broadcast %cst_56 : f32 to vector<8x1xf32>
      %88 = arith.addf %84, %87 : vector<8x1xf32>
      %89 = math.rsqrt %88 : vector<8x1xf32>
      %90 = vector.broadcast %89 : vector<8x1xf32> to vector<8x32xf32>
      %91 = arith.mulf %86, %90 : vector<8x32xf32>
      %92 = vector.broadcast %72 : vector<1x32xf32> to vector<8x32xf32>
      %93 = arith.mulf %91, %92 : vector<8x32xf32>
      %94 = vector.broadcast %73 : vector<1x32xf32> to vector<8x32xf32>
      %95 = arith.addf %93, %94 : vector<8x32xf32>
      %c0_57 = arith.constant 0 : index
      %c0_58 = arith.constant 0 : index
      %96 = vector.load %arg14[%c0_57, %c0_58] : memref<32x64xf32, #tpu.memory_space<vmem>>, vector<32x64xf32>
      %cst_59 = arith.constant dense<0.000000e+00> : vector<8x64xf32>
      %97 = tpu.matmul %95, %96, %cst_59 {dimension_numbers = #tpu.dot_dimension_numbers<[1], [0], [0], [1], [0, 0, 1, 1], [], []>} : vector<8x32xf32>, vector<32x64xf32>, vector<8x64xf32> -> vector<8x64xf32>
      %c0_60 = arith.constant 0 : index
      %c0_61 = arith.constant 0 : index
      %98 = vector.load %arg15[%c0_60, %c0_61] : memref<1x64xf32, #tpu.memory_space<vmem>>, vector<1x64xf32>
      %99 = vector.broadcast %98 : vector<1x64xf32> to vector<8x64xf32>
      %100 = arith.addf %97, %99 : vector<8x64xf32>
      %cst_62 = arith.constant 0.000000e+00 : f32
      %101 = vector.broadcast %cst_62 : f32 to vector<8x64xf32>
      %102 = arith.maximumf %100, %101 : vector<8x64xf32>
      %c0_63 = arith.constant 0 : index
      %c0_64 = arith.constant 0 : index
      %103 = vector.load %arg16[%c0_63, %c0_64] : memref<64x32xf32, #tpu.memory_space<vmem>>, vector<64x32xf32>
      %cst_65 = arith.constant dense<0.000000e+00> : vector<8x32xf32>
      %104 = tpu.matmul %102, %103, %cst_65 {dimension_numbers = #tpu.dot_dimension_numbers<[1], [0], [0], [1], [0, 0, 1, 1], [], []>} : vector<8x64xf32>, vector<64x32xf32>, vector<8x32xf32> -> vector<8x32xf32>
      %c0_66 = arith.constant 0 : index
      %c0_67 = arith.constant 0 : index
      %105 = vector.load %arg17[%c0_66, %c0_67] : memref<1x32xf32, #tpu.memory_space<vmem>>, vector<1x32xf32>
      %106 = vector.broadcast %105 : vector<1x32xf32> to vector<8x32xf32>
      %107 = arith.addf %104, %106 : vector<8x32xf32>
      %108 = arith.addf %95, %107 : vector<8x32xf32>
      %c0_68 = arith.constant 0 : index
      %c0_69 = arith.constant 0 : index
      %109 = vector.load %arg18[%c0_68, %c0_69] : memref<1x32xf32, #tpu.memory_space<vmem>>, vector<1x32xf32>
      %c0_70 = arith.constant 0 : index
      %c0_71 = arith.constant 0 : index
      %110 = vector.load %arg19[%c0_70, %c0_71] : memref<1x32xf32, #tpu.memory_space<vmem>>, vector<1x32xf32>
      %cst_72 = arith.constant dense<0.000000e+00> : vector<8xf32>
      %111 = vector.multi_reduction <add>, %108, %cst_72 [1] : vector<8x32xf32> to vector<8xf32>
      %112 = vector.shape_cast %111 : vector<8xf32> to vector<8x1xf32>
      %cst_73 = arith.constant 3.200000e+01 : f32
      %113 = vector.broadcast %cst_73 : f32 to vector<8x1xf32>
      %114 = arith.divf %112, %113 : vector<8x1xf32>
      %115 = vector.broadcast %114 : vector<8x1xf32> to vector<8x32xf32>
      %116 = arith.subf %108, %115 : vector<8x32xf32>
      %117 = arith.mulf %116, %116 : vector<8x32xf32>
      %cst_74 = arith.constant dense<0.000000e+00> : vector<8xf32>
      %118 = vector.multi_reduction <add>, %117, %cst_74 [1] : vector<8x32xf32> to vector<8xf32>
      %119 = vector.shape_cast %118 : vector<8xf32> to vector<8x1xf32>
      %cst_75 = arith.constant 3.200000e+01 : f32
      %120 = vector.broadcast %cst_75 : f32 to vector<8x1xf32>
      %121 = arith.divf %119, %120 : vector<8x1xf32>
      %122 = vector.broadcast %114 : vector<8x1xf32> to vector<8x32xf32>
      %123 = arith.subf %108, %122 : vector<8x32xf32>
      %cst_76 = arith.constant 9.99999974E-6 : f32
      %124 = vector.broadcast %cst_76 : f32 to vector<8x1xf32>
      %125 = arith.addf %121, %124 : vector<8x1xf32>
      %126 = math.rsqrt %125 : vector<8x1xf32>
      %127 = vector.broadcast %126 : vector<8x1xf32> to vector<8x32xf32>
      %128 = arith.mulf %123, %127 : vector<8x32xf32>
      %129 = vector.broadcast %109 : vector<1x32xf32> to vector<8x32xf32>
      %130 = arith.mulf %128, %129 : vector<8x32xf32>
      %131 = vector.broadcast %110 : vector<1x32xf32> to vector<8x32xf32>
      %132 = arith.addf %130, %131 : vector<8x32xf32>
      %c0_77 = arith.constant 0 : index
      %c0_78 = arith.constant 0 : index
      %c0_79 = arith.constant 0 : index
      %133 = vector.load %arg20[%c0_77, %c0_78, %c0_79] : memref<1x8x32xf32, #tpu.memory_space<vmem>>, vector<1x8x32xf32>
      %134 = vector.shape_cast %133 : vector<1x8x32xf32> to vector<8x32xf32>
      %135 = vector.shape_cast %132 : vector<8x32xf32> to vector<1x8x32xf32>
      tpu.vector_store %arg20[%c0_77, %c0_78, %c0_79], %135 {strides = array<i32>} : memref<1x8x32xf32, #tpu.memory_space<vmem>>, vector<1x8x32xf32>,
    } else {
    }
    return
  }
  func.func @transform_0(%arg0: i32, %arg1: i32, %arg2: i32) -> (i32, i32, i32) {
    %c0_i32 = arith.constant 0 : i32
    %c0_i32_0 = arith.constant 0 : i32
    %c0_i32_1 = arith.constant 0 : i32
    return %arg0, %c0_i32, %c0_i32_0 : i32, i32, i32
  }
  func.func @transform_1(%arg0: i32, %arg1: i32, %arg2: i32) -> (i32, i32, i32) {
    %c0_i32 = arith.constant 0 : i32
    %c0_i32_0 = arith.constant 0 : i32
    %c0_i32_1 = arith.constant 0 : i32
    return %arg2, %c0_i32, %c0_i32_0 : i32, i32, i32
  }
  func.func @transform_2(%arg0: i32, %arg1: i32, %arg2: i32) -> (i32, i32, i32) {
    %c0_i32 = arith.constant 0 : i32
    %c0_i32_0 = arith.constant 0 : i32
    %c0_i32_1 = arith.constant 0 : i32
    return %arg2, %c0_i32, %c0_i32_0 : i32, i32, i32
  }
  func.func @transform_3(%arg0: i32, %arg1: i32, %arg2: i32) -> (i32, i32, i32) {
    %c0_i32 = arith.constant 0 : i32
    %c0_i32_0 = arith.constant 0 : i32
    %c0_i32_1 = arith.constant 0 : i32
    return %arg2, %c0_i32, %c0_i32_0 : i32, i32, i32
  }
  func.func @transform_4(%arg0: i32, %arg1: i32, %arg2: i32) -> (i32, i32, i32) {
    %c0_i32 = arith.constant 0 : i32
    %c0_i32_0 = arith.constant 0 : i32
    %c0_i32_1 = arith.constant 0 : i32
    return %arg2, %c0_i32, %c0_i32_0 : i32, i32, i32
  }
  func.func @transform_5(%arg0: i32, %arg1: i32, %arg2: i32) -> (i32, i32, i32) {
    %c0_i32 = arith.constant 0 : i32
    %c0_i32_0 = arith.constant 0 : i32
    %c0_i32_1 = arith.constant 0 : i32
    return %arg2, %c0_i32, %c0_i32_0 : i32, i32, i32
  }
  func.func @transform_6(%arg0: i32, %arg1: i32, %arg2: i32) -> (i32, i32, i32) {
    %c0_i32 = arith.constant 0 : i32
    %c0_i32_0 = arith.constant 0 : i32
    %c0_i32_1 = arith.constant 0 : i32
    return %arg2, %c0_i32, %c0_i32_0 : i32, i32, i32
  }
  func.func @transform_7(%arg0: i32, %arg1: i32, %arg2: i32) -> (i32, i32, i32) {
    %c0_i32 = arith.constant 0 : i32
    %c0_i32_0 = arith.constant 0 : i32
    %c0_i32_1 = arith.constant 0 : i32
    return %arg2, %c0_i32, %c0_i32_0 : i32, i32, i32
  }
  func.func @transform_8(%arg0: i32, %arg1: i32, %arg2: i32) -> (i32, i32) {
    %c0_i32 = arith.constant 0 : i32
    %c0_i32_0 = arith.constant 0 : i32
    %c0_i32_1 = arith.constant 0 : i32
    return %c0_i32, %c0_i32_0 : i32, i32
  }
  func.func @transform_9(%arg0: i32, %arg1: i32, %arg2: i32) -> (i32, i32) {
    %c0_i32 = arith.constant 0 : i32
    %c0_i32_0 = arith.constant 0 : i32
    %c0_i32_1 = arith.constant 0 : i32
    return %c0_i32, %c0_i32_0 : i32, i32
  }
  func.func @transform_10(%arg0: i32, %arg1: i32, %arg2: i32) -> (i32, i32) {
    %c0_i32 = arith.constant 0 : i32
    %c0_i32_0 = arith.constant 0 : i32
    %c0_i32_1 = arith.constant 0 : i32
    return %c0_i32, %c0_i32_0 : i32, i32
  }
  func.func @transform_11(%arg0: i32, %arg1: i32, %arg2: i32) -> (i32, i32) {
    %c0_i32 = arith.constant 0 : i32
    %c0_i32_0 = arith.constant 0 : i32
    %c0_i32_1 = arith.constant 0 : i32
    return %c0_i32, %c0_i32_0 : i32, i32
  }
  func.func @transform_12(%arg0: i32, %arg1: i32, %arg2: i32) -> (i32, i32) {
    %c0_i32 = arith.constant 0 : i32
    %c0_i32_0 = arith.constant 0 : i32
    %c0_i32_1 = arith.constant 0 : i32
    return %c0_i32, %c0_i32_0 : i32, i32
  }
  func.func @transform_13(%arg0: i32, %arg1: i32, %arg2: i32) -> (i32, i32) {
    %c0_i32 = arith.constant 0 : i32
    %c0_i32_0 = arith.constant 0 : i32
    %c0_i32_1 = arith.constant 0 : i32
    return %c0_i32, %c0_i32_0 : i32, i32
  }
  func.func @transform_14(%arg0: i32, %arg1: i32, %arg2: i32) -> (i32, i32) {
    %c0_i32 = arith.constant 0 : i32
    %c0_i32_0 = arith.constant 0 : i32
    %c0_i32_1 = arith.constant 0 : i32
    return %c0_i32, %c0_i32_0 : i32, i32
  }
  func.func @transform_15(%arg0: i32, %arg1: i32, %arg2: i32) -> (i32, i32) {
    %c0_i32 = arith.constant 0 : i32
    %c0_i32_0 = arith.constant 0 : i32
    %c0_i32_1 = arith.constant 0 : i32
    return %c0_i32, %c0_i32_0 : i32, i32
  }
  func.func @transform_16(%arg0: i32, %arg1: i32, %arg2: i32) -> (i32, i32) {
    %c0_i32 = arith.constant 0 : i32
    %c0_i32_0 = arith.constant 0 : i32
    %c0_i32_1 = arith.constant 0 : i32
    return %c0_i32, %c0_i32_0 : i32, i32
  }
  func.func @transform_17(%arg0: i32, %arg1: i32, %arg2: i32) -> (i32, i32, i32) {
    %c0_i32 = arith.constant 0 : i32
    %c0_i32_0 = arith.constant 0 : i32
    return %arg0, %arg1, %c0_i32 : i32, i32, i32
  }
  func.func @transform_18(%arg0: i32, %arg1: i32, %arg2: i32) -> (i32, i32, i32, i32) {
    %c0_i32 = arith.constant 0 : i32
    %c0_i32_0 = arith.constant 0 : i32
    return %arg0, %arg2, %arg1, %c0_i32 : i32, i32, i32, i32
  }
}

</mosaic_0001>

<bundles_post_ra>
// kernel: tpu_custom_call.1
= control target key start
LH: loop header
LB: loop body
LE: loop exit
PB: predicated region body
PF: predicated region fallthrough
CT: control target
= control target key end

     0   :  { %s2075_s0 = inlined_call_operand.vmem [shape: f32[2,8,32], index: 0, kind: input, shape index: {}]   ;;  %s2076_s1 = inlined_call_operand.vmem [shape: f32[4,32,8], index: 1, kind: input, shape index: {}]   ;;  %s2077_s2 = inlined_call_operand.vmem [shape: f32[4,1,8], index: 2, kind: input, shape index: {}]   ;;  %s2078_s3 = inlined_call_operand.vmem [shape: f32[4,32,8], index: 3, kind: input, shape index: {}]   ;;  %s2079_s4 = inlined_call_operand.vmem [shape: f32[4,1,8], index: 4, kind: input, shape index: {}]   ;;  %s2080_s5 = inlined_call_operand.vmem [shape: f32[4,32,8], index: 5, kind: input, shape index: {}]   ;;  %s2081_s6 = inlined_call_operand.vmem [shape: f32[4,1,8], index: 6, kind: input, shape index: {}]   ;;  %s2082_s7 = inlined_call_operand.vmem [shape: f32[4,8,32], index: 7, kind: input, shape index: {}]   ;;  %s2083_s8 = inlined_call_operand.vmem [shape: f32[1,32], index: 8, kind: input, shape index: {}]   ;;  %s2084_s9 = inlined_call_operand.vmem [shape: f32[1,32], index: 9, kind: input, shape index: {}]   ;;  %s2085_s10 = inlined_call_operand.vmem [shape: f32[1,32], index: 10, kind: input, shape index: {}]   ;;  %s2086_s11 = inlined_call_operand.vmem [shape: f32[32,64], index: 11, kind: input, shape index: {}]   ;;  %s2087_s12 = inlined_call_operand.vmem [shape: f32[1,64], index: 12, kind: input, shape index: {}]   ;;  %s2088_s13 = inlined_call_operand.vmem [shape: f32[64,32], index: 13, kind: input, shape index: {}]   ;;  %s2089_s14 = inlined_call_operand.vmem [shape: f32[1,32], index: 14, kind: input, shape index: {}]   ;;  %s2090_s15 = inlined_call_operand.vmem [shape: f32[1,32], index: 15, kind: input, shape index: {}]   ;;  %s2091_s16 = inlined_call_operand.vmem [shape: f32[1,32], index: 16, kind: input, shape index: {}]   ;;  %s2092_s17 = inlined_call_operand.hbm [shape: f32[2,8,32], index: 17, kind: output, shape index: {0}]   ;;  %s2093_s18 = inlined_call_operand.hbm [shape: f32[2,4,8,8], index: 18, kind: output, shape index: {1}]  }
   0x1   :  { %2119 = sst [smem:[#allocation27_spill]] %s2075_s0 }
   0x2   :  { %2120 = sst [smem:[#allocation28_spill]] %s2076_s1 }
   0x3   :  { %2121 = sst [smem:[#allocation29_spill]] %s2077_s2 }
   0x4   :  { %2122 = sst [smem:[#allocation30_spill]] %s2078_s3 }
   0x5   :  { %2123 = sst [smem:[#allocation31_spill]] %s2084_s9 }
   0x6   :  { %2124 = sst [smem:[#allocation32_spill]] %s2085_s10 }
   0x7   :  { %2125 = sst [smem:[#allocation33_spill]] %s2087_s12 }
   0x8   :  { %2126 = sst [smem:[#allocation34_spill]] %s2088_s13 }
   0x9   :  { %2127 = sst [smem:[#allocation35_spill]] %s2089_s14 }
   0xa   :  { %2128 = sst [smem:[#allocation36_spill]] %s2090_s15 }
   0xb   :  { %2129 = sst [smem:[#allocation37_spill]] %s2091_s16 }
   0xc   :  { %2130 = sst [smem:[#allocation38_spill]] %s2092_s17 }
   0xd   :  { %2131 = sst [smem:[#allocation39_spill]] %s2093_s18 }
   0xe   :  { %24 = vsyncpa [#allocation4], 0 }
   0xf   :  { %26 = vsyncpa [#allocation4 + $0x1], 0 }
  0x10   :  { %27 = vsyncpa [#allocation6], 0 }
  0x11   :  { %29 = vsyncpa [#allocation6 + $0x1], 0  ;;  %s1714_s27 = smov 0   ;;  %s1716_s28 = smov 0  }
  0x12   :  { %s1718_s29 = smov 0   ;;  %s1720_s30 = smov 0  }
  0x13   :  { %s1722_s0 = smov 0   ;;  %s1724_s19 = smov 0  }
  0x14   :  { %s1726_s1 = smov 0   ;;  %s1728_s20 = smov 0  }
  0x15   :  { %s1730_s21 = smov 0   ;;  %s1732_s22 = smov 0  }
  0x16   :  { %s1734_s2 = smov 0  }
  0x17 LB: > { %2132 = sst [smem:[#allocation9_spill]] %s1575_s27  ;;  %s1307_s23 = sadd.s32 4294967295, %s1615_s2   ;;  %s1615_s2 = sphi %s1734_s2, %s35_s2   ;;  %s1611_s22 = sphi %s1732_s22, %s2192_s22   ;;  %s1607_s21 = sphi %s1730_s21, %s2191_s21   ;;  %s1603_s20 = sphi %s1728_s20, %s2190_s20   ;;  %s1599_s1 = sphi %s1726_s1, %s2189_s1   ;;  %s1595_s19 = sphi %s1724_s19, %s2188_s19   ;;  %s1591_s0 = sphi %s1722_s0, %s2187_s0   ;;  %s1587_s30 = sphi %s1720_s30, %s2186_s30   ;;  %s1583_s29 = sphi %s1718_s29, %s2185_s29   ;;  %s1579_s28 = sphi %s1716_s28, %s2184_s28   ;;  %s1575_s27 = sphi %s1714_s27, %s2183_s27  }
  0x18   : > { %2133 = sst [smem:[#allocation10_spill]] %s1579_s28  ;;  %s1308_s24 = sadd.s32 4294967294, %s1615_s2  }
  0x19   : > { %2134 = sst [smem:[#allocation11_spill]] %s1583_s29  ;;  %s47_s25 = sadd.s32 1, %s1607_s21 }
  0x1a   : > { %2135 = sst [smem:[#allocation12_spill]] %s1587_s30  ;;  %s54_s26 = sadd.s32 1, %s1611_s22 }
  0x1b   : > { %2136 = sst [smem:[#allocation13_spill]] %s1591_s0  ;;  %p48_p0 = scmp.ge.s32.totalorder %s47_s25, 4 }
  0x1c   : > { %2137 = sst [smem:[#allocation14_spill]] %s1595_s19  ;;  %s460_s18 = sadd.s32 1, %s1595_s19 }
  0x1d   : > { %2138 = sst [smem:[#allocation15_spill]] %s1603_s20  ;;  %p470_p1 = scmp.ne.s32.totalorder %s1595_s19, %s1591_s0 }
  0x1e   : > { %2139 = sst [smem:[#allocation16_spill]] %s1607_s21  ;;  %p1776_p2 = scmp.eq.s32.totalorder %s1307_s23, 7 }
  0x1f   : > { %2140 = sst [smem:[#allocation17_spill]] %s1611_s22  ;;  %s2194_s25 = smov (%p48_p0, %s47_s25), 0 }
  0x20   : > { %2141 = sst [smem:[#allocation18_spill]] %s1615_s2  ;;  %s2196_s26 = smov (!%p48_p0, %s54_s26), %s1611_s22 }
  0x21   : > { %2143 = sst [smem:[#allocation19_spill]] %s2194_s25  ;;  %p1785_p3 = por %p1776_p2, %p470_p1 }
  0x22   : > { %p476_p4 = scmp.ne.s32.totalorder %s1591_s0, %s1587_s30  ;;  %p56_p5 = scmp.ge.s32.totalorder %s2196_s26, 2 }
  0x23   : > { %s2144_s16 = scalar_select %p1785_p3, 1, 0 }
  0x24   : > { %p1791_p6 = scmp.eq.s32.totalorder %s1308_s24, 7  ;;  %s484_s15 = ssub.s32 %s1607_s21, %s2194_s25 }
  0x25   : > { %2145 = sst [smem:[#allocation20_spill]] %s2144_s16  ;;  %s490_s14 = sadd.s32 1, %s1583_s29 }
  0x26   : > { %s2198_s26 = smov (%p56_p5, %s2196_s26), 0  ;;  %p1802_p7 = por %p1791_p6, %p476_p4 }
  0x27   : > { %2147 = sst [smem:[#allocation21_spill]] %s2198_s26  ;;  %p500_p8 = scmp.ne.s32.totalorder %s1583_s29, %s1579_s28 }
  0x28   : > { %s2148_s12 = scalar_select %p1802_p7, 1, 0 }
  0x29   : > { %s455_s30 = ssub.s32 %s1611_s22, %s2198_s26  ;;  %p506_p9 = scmp.ne.s32.totalorder %s1579_s28, %s1575_s27 }
  0x2a   : > { %2149 = sst [smem:[#allocation22_spill]] %s2148_s12  ;;  %p458_p10 = scmp.eq.s32.totalorder %s455_s30, 0 }
  0x2b   : > { %s485_s24 = sor.u32 %s484_s15, %s455_s30  ;;  %p1814_p12 = por %p500_p8, %p1776_p2 }
  0x2c   : > { %p488_p11 = scmp.eq.s32.totalorder %s485_s24, 0  ;;  %p1826_p13 = por %p506_p9, %p1791_p6 }
  0x2d   : > { %s2150_s16 = scalar_select %p1814_p12, 1, 0 }
  0x2e   : > { %s1819_s25 = scalar_select %p458_p10, %s1595_s19, %s460_s18  }
  0x2f   : > { %2151 = sst [smem:[#allocation23_spill]] %s2150_s16  ;;  %p1311_p0 = scmp.ge.s32.totalorder %s1615_s2, 1 }
  0x30   : > { %2152 = sst [smem:[#allocation24_spill]] %s1819_s25  ;;  %p608_p1 = scmp.lt.s32.totalorder %s1615_s2, 9 }
  0x31   : > { %s1822_s21 = scalar_select %p488_p11, %s1583_s29, %s490_s14  }
  0x32   : > { %s2154_s10 = scalar_select %p1826_p13, 1, 0 }
  0x33   : > { %2153 = sst [smem:[#allocation25_spill]] %s1822_s21  ;;  %p609_p4 = pnand %p1311_p0, %p608_p1 }
  0x34   : > { %2155 = sst [smem:[#allocation26_spill]] %s2154_s10  ;;  %s2103_s15 = sand.u32 (!%p609_p4), 1, %s1591_s0  }
  0x35   : > { %612 = sbr.rel (%p609_p4) target bundleno = 1715 (0x6b3), region = 88  ;;  %s2104_s14 = sand.u32 (!%p609_p4), 1, %s1579_s28  }
  0x36   : > { %s1836_s17 = sshll.u32 (!%p609_p4), %s2103_s15, 3  ;;  %s1840_s18 = sshll.u32 (!%p609_p4), %s2104_s14, 3 }
  0x37   : > { %p694_p2 = scmp.lt.s32.totalorder (!%p609_p4), %s1603_s20, 1  ;;  %p698_p5 = scmp.lt.s32.totalorder (!%p609_p4), %s1599_s1, 3 }
  0x38   : > { %s2156_s15 = sld [smem:[#allocation27_spill]] (!%p609_p4)  ;;  %s686_s28 = scalar_lea.vmem (!%p609_p4), [#allocation3], %s1836_s17 }
  0x39   : > { %s2157_s29 = sld [smem:[#allocation28_spill]] (!%p609_p4)  ;;  %s693_s0 = scalar_lea.vmem (!%p609_p4), [#allocation5], %s1840_s18 }
  0x3a   : > { %s695_s30 = scalar_select %p694_p2, %s1603_s20, 1 }
  0x3b   : > { %s1846_s23 = scalar_select %p698_p5, %s1599_s1, 3 }
  0x3c   : > { %s1314_s24 = sshll.u32 %s695_s30, 3  ;;  %s2158_s2 = sld [smem:[#allocation29_spill]] }
  0x3d   : > { %s1340_s14 = sshll.u32 %s1846_s23, 5  ;;  %s2159_s3 = sld [smem:[#allocation30_spill]] }
  0x3e   : > { %s1851_s25 = scalar_lea.vmem %s2156_s15, %s1314_s24  ;;  %s713_s13 = scalar_lea.vmem %s2079_s4, %s1846_s23 }
  0x3f   : > { %s702_s10 = scalar_lea.vmem %s2157_s29, %s1340_s14  ;;  %s1871_s15 = scalar_lea.vmem %s2080_s5, %s1340_s14 }
  0x40   : > { %s721_s29 = scalar_lea.vmem %s2081_s6, %s1846_s23  ;;  %s1321_s21 = sshll.u32 %s1846_s23, 3 }
  0x41   : > { %p1322_p6 = scmp.ne.s32.totalorder %s1599_s1, 0 }
  0x42   : > { %s705_s16 = scalar_lea.vmem %s2158_s2, %s1846_s23  ;;  %s1881_s2 = scalar_lea.vmem %s2082_s7, %s1321_s21 }
  0x43   : > { %s710_s20 = scalar_lea.vmem %s2159_s3, %s1340_s14  ;;  %730 = sbr.rel (%p1322_p6) target bundleno = 74 (0x4a), region = 92 }
  0x48   : > { %vm731_vm0 = vcmask 261120   ;;  %v1617_v0 = vmov 0.0  }
  0x49   : > { %732 = vst.msk [vmem:[#allocation2] sm:$0xff] %vm731_vm0, %v1617_v0 }
  0x4a PF: > { %v743_v1 = vld [vmem:[%s710_s20 + $0x18] sm:$0xff]  ;;  %v742_v2 = vld [vmem:[%s710_s20 + $0x10] sm:$0xff]  ;;  %v741_v5 = vld [vmem:[%s710_s20 + $0x8] sm:$0xff]  ;;  %vm754_vm1 = vcmask 261120   ;;  %vm827_vm2 = vcmask 64512   ;;  %v855_v20 = vlaneseq  ;;  %p1330_p8 = scmp.ne.s32.totalorder %s1599_s1, 3 }
  0x4b   : > { %v739_v3 = vld [vmem:[%s702_s10 + $0x18] sm:$0xff]  ;;  %796 = vmatpush.msra.mxu1 %v743_v1  ;;  %v738_v4 = vld [vmem:[%s702_s10 + $0x10] sm:$0xff]  ;;  %v737_v6 = vld [vmem:[%s702_s10 + $0x8] sm:$0xff]  ;;  %s2161_s9 = sld [smem:[#allocation34_spill]] (!%p1330_p8) }
  0x4c   : > { %770 = vmatpush.msra.mxu0 %v739_v3  ;;  %v740_v7 = vld [vmem:[%s710_s20] sm:$0xff]  ;;  %v747_v16 = vld [vmem:[%s1871_s15 + $0x18] sm:$0xff]  ;;  %v746_v17 = vld [vmem:[%s1871_s15 + $0x10] sm:$0xff]  ;;  %v856_v21 = vshrl.u32 %v855_v20, 7  ;;  %v860_v22 = vand.u32 127, %v855_v20  ;;  %s2165_s30 = sld [smem:[#allocation35_spill]] (!%p1330_p8) }
  0x4d   : > { %797 = vmatpush.msra.mxu1 %v742_v2  ;;  %v736_v8 = vld [vmem:[%s702_s10] sm:$0xff]  ;;  %819 = vmatpush.msra.mxu2 %v747_v16  ;;  %v745_v18 = vld [vmem:[%s1871_s15 + $0x8] sm:$0xff] }
  0x4e   : > { %771 = vmatpush.msra.mxu0 %v738_v4  ;;  %v1887_v9 = vld [vmem:[%s1851_s25] sm:$0xff]  ;;  %v861_v23 = vsub.s32 %v856_v21, %v860_v22 }
  0x4f   : > { %798 = vmatpush.msra.mxu1 %v741_v5  ;;  %v1445_v10 = vld [vmem:[%s713_s13] ss:$0 sm:$0xff]  ;;  %820 = vmatpush.msra.mxu2 %v746_v17  ;;  %s2164_s13 = sld [smem:[#allocation33_spill]] (!%p1330_p8) }
  0x50   : > { %772 = vmatpush.msra.mxu0 %v737_v6  ;;  %v1446_v11 = vld [vmem:[%s705_s16] ss:$0 sm:$0xff]  ;;  %v863_v24 = vsub.s32 0, %v861_v23  ;;  %vm862_vm3 = vcmp.lt.s32.totalorder %v861_v23, 0 }
  0x51   : > { %799 = vmatpush.msra.mxu1 %v740_v7  ;;  %v744_v19 = vld [vmem:[%s1871_s15] sm:$0xff]  ;;  %821 = vmatpush.msra.mxu2 %v745_v18  ;;  %s2162_s15 = sld [smem:[#allocation31_spill]] (!%p1330_p8) }
  0x52   : > { %773 = vmatpush.msra.mxu0 %v736_v8  ;;  %1324 = vmatmul.msk.f32.vlgmr.msra.gmra.mxu1 %vm754_vm1, %v1887_v9  ;;  %v864_v25 = vsel %vm862_vm3, %v863_v24, %v861_v23  ;;  %v1447_v30 = vld [vmem:[%s721_s29] ss:$0 sm:$0xff]  ;;  %s2163_s29 = sld [smem:[#allocation32_spill]] (!%p1330_p8) }
  0x53   : > { %1323 = vmatmul.msk.f32.vlgmr.msra.gmra.mxu0 %vm754_vm1, %v1887_v9  ;;  %822 = vmatpush.msra.mxu2 %v744_v19  ;;  %vm865_vm4 = vcmp.le.s32.totalorder %v864_v25, 2  ;;  %v903_v38 = vld [vmem:[%s1881_s2] sm:$0xff] }
  0x54   : > { %1325 = vmatmul.msk.f32.vlgmr.msra.gmra.mxu2 %vm754_vm1, %v1887_v9  ;;  %922 = vmatpush.msrb.mxu0 %v903_v38  ;;  %v902_v43 = vld [vmem:[#allocation2] sm:$0xff] }
  0xcf   : > { %v801_v12 = vpop.f32.mrf.mxu1 }
  0xd0   : > { %v775_v13 = vpop.f32.mrf.mxu0  ;;  %v802_v14 = vadd.f32 %v1445_v10, %v801_v12 }
  0xd1   : > { %v776_v15 = vadd.f32 %v1446_v11, %v775_v13 }
  0xd2   : > { %1326 = vmatpush.xpose.msk.msra.mxu3 %vm827_vm2, %v802_v14 }
  0xd5   : > { %1327 = vmatmul.msk.f32.vlgmr.msra.gmra.mxu3 %vm827_vm2, %v776_v15 }
  0xd7   : > { %v824_v31 = vpop.f32.mrf.mxu2 }
  0xd8   : > { %v825_v32 = vadd.f32 %v1447_v30, %v824_v31 }
  0xda   : > { %897 = vmatpush.msrb.mxu3 %v825_v32 }
 0x158   : > { %v851_v26 = vpop.f32.mrf.mxu3 }
 0x159   : > { %v854_v27 = vmul.f32 0.35355338, %v851_v26 }
 0x15b   : > { %v866_v28 = vsel %vm865_vm4, %v854_v27, -inf }
 0x15c   : > { %v867_v29 = vsel %vm827_vm2, %v866_v28, -inf }
 0x15d   : > { %868 = vmax.xlane.f32.xlu0 %v867_v29 }
 0x1d0   : > { %v869_v33 = vpop.xlane.xlu0 %868 }
 0x1d1   : > { %v870_v34 = vsub.f32 %v866_v28, %v869_v33 }
 0x1d3   : > { %v871_v35 = vmul.f32 1.442695, %v870_v34 }
 0x1d5   : > { %1448 = vpow2.f32 %v871_v35 }
 0x1db   : > { %v1449_v36 = vpop.eup %1448 }
 0x1dc   : > { %v873_v37 = vsel %vm827_vm2, %v1449_v36, 0.0 }
 0x1dd   : > { %874 = vadd.xlane.f32.xlu0 %v873_v37 }
 0x250   : > { %v875_v39 = vpop.xlane.xlu0 %874 }
 0x251   : > { %1450 = vrcp.f32 %v875_v39 }
 0x257   : > { %v1451_v40 = vpop.eup %1450 }
 0x258   : > { %v877_v41 = vmul.f32 %v1451_v40, %v1449_v36 }
 0x25a   : > { %878 = vst.msk [vmem:[%s693_s0] sm:$0xff] %vm827_vm2, %v877_v41  ;;  %1328 = vmatmul.msk.f32.vlgmr.msrb.gmra.mxu3 %vm827_vm2, %v877_v41 }
 0x2dd   : > { %v899_v42 = vpop.f32.mrf.mxu3 }
 0x2de   : > { %1329 = vmatmul.msk.f32.vlgmr.msrb.gmra.mxu0 %vm827_vm2, %v899_v42 }
 0x35a   : > { %932 = sbr.rel (%p1330_p8) target bundleno = 1671 (0x687), region = 96 }
 0x35b   : > { %v924_v44 = vpop.f32.mrf.mxu0 }
 0x35c   : > { %v927_v45 = vadd.f32 %v924_v44, %v902_v43 }
 0x35e   : > { %928 = vst.msk [vmem:[#allocation2] sm:$0xff] %vm754_vm1, %v927_v45 }
 0x35f   : > { %v1452_v47 = vld [vmem:[%s2083_s8] ss:$0 sm:$0xff]  ;;  %v1618_v51 = vmov 32.0   ;;  %v982_v63 = vld [vmem:[%s2086_s11 + $0x18] sm:$0xff]  ;;  %v981_v0 = vld [vmem:[%s2086_s11 + $0x10] sm:$0xff]  ;;  %vm1023_vm9 = vcmask 523264  }
 0x360   : > { %1459 = vrcp.f32 %v1618_v51  ;;  %1002 = vmatpush.msra.mxu0 %v982_v63  ;;  %v980_v1 = vld [vmem:[%s2086_s11 + $0x8] sm:$0xff]  ;;  %v979_v2 = vld [vmem:[%s2086_s11] sm:$0xff]  ;;  %v1018_v3 = vld [vmem:[%s2161_s9 + $0x38] sm:$0xff] }
 0x361   : > { %v1017_v4 = vld [vmem:[%s2161_s9 + $0x30] sm:$0xff]  ;;  %1035 = vmatpush.msra.mxu1 %v1018_v3  ;;  %v1016_v5 = vld [vmem:[%s2161_s9 + $0x28] sm:$0xff]  ;;  %v1015_v8 = vld [vmem:[%s2161_s9 + $0x20] sm:$0xff] }
 0x362   : > { %1003 = vmatpush.msra.mxu0 %v981_v0  ;;  %v1014_v10 = vld [vmem:[%s2161_s9 + $0x18] sm:$0xff]  ;;  %v1453_v17 = vld [vmem:[%s2162_s15] ss:$0 sm:$0xff]  ;;  %v1013_v23 = vld [vmem:[%s2161_s9 + $0x10] sm:$0xff]  ;;  %s2166_s15 = sld [smem:[#allocation36_spill]] }
 0x363   : > { %1036 = vmatpush.msra.mxu1 %v1017_v4  ;;  %v1454_v20 = vld [vmem:[%s2163_s29] ss:$0 sm:$0xff]  ;;  %v1012_v24 = vld [vmem:[%s2161_s9 + $0x8] sm:$0xff]  ;;  %s2167_s29 = sld [smem:[#allocation37_spill]] }
 0x364   : > { %1004 = vmatpush.msra.mxu0 %v980_v1  ;;  %v1011_v25 = vld [vmem:[%s2161_s9] sm:$0xff] }
 0x365   : > { %v933_v46 = vld [vmem:[#allocation2] sm:$0xff]  ;;  %1037 = vmatpush.msra.mxu1 %v1016_v5 }
 0x366   : > { %v938_v48 = vadd.f32 %v1452_v47, %v933_v46  ;;  %v1460_v52 = vpop.eup %1459  ;;  %1005 = vmatpush.msra.mxu0 %v979_v2  ;;  %v1455_v26 = vld [vmem:[%s2164_s13] ss:$0 sm:$0xff] }
 0x367   : > { %v946_v53 = vmul.f32 32.0, %v1460_v52  ;;  %vm950_vm5 = vweird.f32 %v1460_v52  ;;  %1038 = vmatpush.msra.mxu1 %v1015_v8  ;;  %v1456_v30 = vld [vmem:[%s2165_s30] ss:$0 sm:$0xff] }
 0x368   : > { %v939_v49 = vadd.f32 %v938_v48, %v1887_v9 }
 0x369   : > { %v947_v54 = vsub.f32 1.0, %v946_v53  ;;  %1039 = vmatpush.msra.mxu1 %v1014_v10  ;;  %v1458_v51 = vld [vmem:[%s2167_s29] ss:$0 sm:$0xff] }
 0x36a   : > { %v942_v50 = vsel %vm754_vm1, %v939_v49, 0.0 }
 0x36b   : > { %943 = vadd.xlane.f32.xlu0 %v942_v50  ;;  %v948_v55 = vmul.f32 %v1460_v52, %v947_v54  ;;  %1040 = vmatpush.msra.mxu1 %v1013_v23 }
 0x36d   : > { %v949_v56 = vadd.f32 %v1460_v52, %v948_v55  ;;  %1041 = vmatpush.msra.mxu1 %v1012_v24 }
 0x36f   : > { %v1931_v57 = vsel %vm950_vm5, %v1460_v52, %v949_v56  ;;  %1042 = vmatpush.msra.mxu1 %v1011_v25 }
 0x3de   : > { %v944_v58 = vpop.xlane.xlu0 %943 }
 0x3df   : > { %v952_v59 = vmul.f32 %v1931_v57, %v944_v58 }
 0x3e1   : > { %v953_v60 = vsub.f32 %v939_v49, %v952_v59  ;;  %v1457_v49 = vld [vmem:[%s2166_s15] ss:$0 sm:$0xff] }
 0x3e3   : > { %v954_v61 = vmul.f32 %v953_v60, %v953_v60 }
 0x3e5   : > { %v955_v62 = vsel %vm754_vm1, %v954_v61, 0.0 }
 0x3e6   : > { %956 = vadd.xlane.f32.xlu0 %v955_v62 }
 0x459   : > { %v957_v6 = vpop.xlane.xlu0 %956 }
 0x45a   : > { %v958_v7 = vmul.f32 %v957_v6, %v1931_v57 }
 0x45c   : > { %v959_v9 = vadd.f32 1e-05, %v958_v7 }
 0x45e   : > { %1461 = vrsqrt.f32 %v959_v9  ;;  %vm966_vm7 = vweird.f32 %v959_v9 }
 0x464   : > { %v1462_v11 = vpop.eup %1461 }
 0x465   : > { %v961_v12 = vmul.f32 %v1462_v11, %v959_v9  ;;  %vm967_vm6 = vweird.f32 %v1462_v11 }
 0x466   : > { %vm968_vm8 = vmor %vm966_vm7, %vm967_vm6 }
 0x467   : > { %v962_v13 = vmul.f32 %v1462_v11, %v961_v12 }
 0x469   : > { %v963_v14 = vmul.f32 0.5, %v962_v13 }
 0x46b   : > { %v964_v15 = vsub.f32 1.5, %v963_v14 }
 0x46d   : > { %v965_v16 = vmul.f32 %v1462_v11, %v964_v15 }
 0x46f   : > { %v969_v18 = vsel %vm968_vm8, %v1462_v11, %v965_v16 }
 0x470   : > { %v970_v19 = vmul.f32 %v969_v18, %v953_v60 }
 0x472   : > { %v974_v21 = vmul.f32 %v1453_v17, %v970_v19 }
 0x474   : > { %v978_v22 = vadd.f32 %v1454_v20, %v974_v21 }
 0x476   : > { %1331 = vmatmul.msk.f32.vlgmr.msra.gmra.mxu0 %vm754_vm1, %v978_v22 }
 0x4f3   : > { %v1007_v27 = vpop.f32.mrf.mxu0 }
 0x4f4   : > { %v1008_v28 = vadd.f32 %v1455_v26, %v1007_v27 }
 0x4f6   : > { %v1010_v29 = vmax.f32 %v1008_v28, 0.0 }
 0x4f8   : > { %1332 = vmatmul.msk.f32.vlgmr.msra.gmra.mxu1 %vm1023_vm9, %v1010_v29 }
 0x575   : > { %v1044_v31 = vpop.f32.mrf.mxu1 }
 0x576   : > { %v1045_v32 = vadd.f32 %v1456_v30, %v1044_v31 }
 0x578   : > { %v1047_v33 = vadd.f32 %v1045_v32, %v978_v22 }
 0x57a   : > { %v1050_v34 = vsel %vm754_vm1, %v1047_v33, 0.0 }
 0x57b   : > { %1051 = vadd.xlane.f32.xlu1 %v1050_v34 }
 0x5ee   : > { %v1052_v35 = vpop.xlane.xlu1 %1051 }
 0x5ef   : > { %v1053_v36 = vmul.f32 %v1052_v35, %v1931_v57 }
 0x5f1   : > { %v1054_v37 = vsub.f32 %v1047_v33, %v1053_v36 }
 0x5f3   : > { %v1055_v38 = vmul.f32 %v1054_v37, %v1054_v37 }
 0x5f5   : > { %v1056_v39 = vsel %vm754_vm1, %v1055_v38, 0.0 }
 0x5f6   : > { %1057 = vadd.xlane.f32.xlu1 %v1056_v39 }
 0x669   : > { %v1058_v40 = vpop.xlane.xlu1 %1057 }
 0x66a   : > { %v1059_v41 = vmul.f32 %v1058_v40, %v1931_v57 }
 0x66c   : > { %v1060_v42 = vadd.f32 1e-05, %v1059_v41 }
 0x66e   : > { %1463 = vrsqrt.f32 %v1060_v42  ;;  %vm1067_vm11 = vweird.f32 %v1060_v42 }
 0x674   : > { %v1464_v43 = vpop.eup %1463 }
 0x675   : > { %v1062_v44 = vmul.f32 %v1464_v43, %v1060_v42  ;;  %vm1068_vm10 = vweird.f32 %v1464_v43 }
 0x676   : > { %vm1069_vm12 = vmor %vm1067_vm11, %vm1068_vm10 }
 0x677   : > { %v1063_v45 = vmul.f32 %v1464_v43, %v1062_v44 }
 0x679   : > { %v1064_v46 = vmul.f32 0.5, %v1063_v45 }
 0x67b   : > { %v1065_v47 = vsub.f32 1.5, %v1064_v46 }
 0x67d   : > { %v1066_v48 = vmul.f32 %v1464_v43, %v1065_v47 }
 0x67f   : > { %v1070_v50 = vsel %vm1069_vm12, %v1464_v43, %v1066_v48 }
 0x680   : > { %v1071_v52 = vmul.f32 %v1070_v50, %v1054_v37 }
 0x682   : > { %v1075_v53 = vmul.f32 %v1457_v49, %v1071_v52 }
 0x684   : > { %v1079_v54 = vadd.f32 %v1458_v51, %v1075_v53 }
 0x686   : > { %1080 = vst.msk [vmem:[%s686_s28] sm:$0xff] %vm754_vm1, %v1079_v54 }
 0x687 PF: > { %s2168_s21 = sld [smem:[#allocation15_spill]]  ;;  %s1100_s13 = sshll.u32 %s686_s28, 4  ;;  %s1101_s13 = int_to_ptr.vmem [resolvable:$true] %s1100_s13 }
 0x688   : > { %s2169_s12 = sld [smem:[#allocation13_spill]] }
 0x689   : > { %s2171_s25 = sld [smem:[#allocation38_spill]] }
 0x68d   : > { %s1335_s2 = sshll.u32 %s2168_s21, 3 }
 0x68e   : > { %s2172_s23 = sand.u32 1, %s2169_s12  }
 0x68f   : > { %s1098_s14 = scalar_lea.hbm %s2171_s25, %s1335_s2  ;;  %s1082_s30 = scalar_lea.sflag [#allocation4], %s2172_s23 }
 0x690   : > { %s1102_s16 = sshll.u32 %s1098_s14, 4  ;;  %s1485_s19 = scalar_lea.hbm %s2171_s25, 16  ;;  %s1103_s16 = int_to_ptr.hbm [resolvable:$true] %s1102_s16 }
 0x691   : > { %s1479_s22 = sshra.s32 %s1103_s16, 4  ;;  %s1480_s22 = int_to_ptr.hbm [resolvable:$true] %s1479_s22 }
 0x692   : > { %s1481_s26 = scalar_lea.hbm %s1480_s22, 8  ;;  %p1486_p0 = scmp.lt.s32.totalorder %s1480_s22, %s2171_s25 }
 0x693   : > { %p1482_p9 = scmp.ne.s32.totalorder %s1480_s22, %s1481_s26  ;;  %p1487_p1 = scmp.lt.s32.totalorder %s1485_s19, %s1481_s26 }
 0x695   : > { %p1483_p10 = pnand %p1482_p9, %p1785_p3  ;;  %p1488_p4 = por %p1487_p1, %p1486_p0 }
 0x697   : > { %p1484_p11 = pneg %p1483_p10 }
 0x699   : > { %p1489_p2 = pnand %p1488_p4, %p1484_p11 }
 0x69b   : > { %1492 = shalt.err (!%p1489_p2)
}
 0x69c   : > { %s2173_s17 = sld [smem:[#allocation10_spill]]  ;;  %s1336_s12 = sshll.u32 %s2168_s21, 2 }
 0x69d   : > { %1343 = dma.vmem_to_hbm [thread:$0]  (%p1785_p3), %s1101_s13, 128, %s1103_s16, %s1082_s30  }
 0x69e   : > { %s1117_s20 = sshll.u32 %s693_s0, 4  ;;  %s1113_s10 = sadd.s32 %s1599_s1, %s1336_s12  ;;  %s1118_s20 = int_to_ptr.vmem [resolvable:$true] %s1117_s20 }
 0x69f   : > { %s1337_s14 = sshll.u32 %s1113_s10, 3  ;;  %s2175_s22 = sld [smem:[#allocation39_spill]] }
 0x6a2   : > { %s2177_s29 = sand.u32 1, %s2173_s17  }
 0x6a3   : > { %s1087_s27 = scalar_lea.sflag [#allocation6], %s2177_s29 }
 0x6a5   : > { %s2176_s24 = smov %s2175_s22  ;;  %s1115_s26 = scalar_lea.hbm %s2175_s22, %s1337_s14 }
 0x6a6   : > { %s1119_s19 = sshll.u32 %s1115_s26, 4  ;;  %s1513_s1 = scalar_lea.hbm %s2176_s24, 64  ;;  %s1120_s19 = int_to_ptr.hbm [resolvable:$true] %s1119_s19 }
 0x6a7   : > { %s1507_s2 = sshra.s32 %s1120_s19, 4  ;;  %s1508_s2 = int_to_ptr.hbm [resolvable:$true] %s1507_s2 }
 0x6a8   : > { %s1509_s3 = scalar_lea.hbm %s1508_s2, 8  ;;  %p1514_p8 = scmp.lt.s32.totalorder %s1508_s2, %s2176_s24 }
 0x6a9   : > { %p1510_p5 = scmp.ne.s32.totalorder %s1508_s2, %s1509_s3  ;;  %p1515_p9 = scmp.lt.s32.totalorder %s1513_s1, %s1509_s3 }
 0x6ab   : > { %p1511_p3 = pnand %p1510_p5, %p1814_p12  ;;  %p1516_p10 = por %p1515_p9, %p1514_p8 }
 0x6ad   : > { %p1512_p6 = pneg %p1511_p3 }
 0x6af   : > { %p1517_p11 = pnand %p1516_p10, %p1512_p6 }
 0x6b1   : > { %1520 = shalt.err (!%p1517_p11)
}
 0x6b2   : > { %1344 = dma.vmem_to_hbm [thread:$0]  (%p1814_p12), %s1118_s20, 128, %s1120_s19, %s1087_s27  }
 0x6b3 PF: > { %s2178_s16 = sld [smem:[#allocation18_spill]] }
 0x6b4   : > { %s2179_s30 = sld [smem:[#allocation12_spill]] }
 0x6b9   : > { %p1354_p0 = scmp.ge.s32.totalorder %s2178_s16, 2 }
 0x6ba   : > { %s1131_s12 = sand.u32 1, %s2179_s30  }
 0x6bb   : > { %p1348_p1 = pnand %p1354_p0, %p1802_p7  ;;  %s1132_s10 = scalar_lea.sflag [#allocation4], %s1131_s12 }
 0x6bd   : > { %p1349_p4 = pneg %p1348_p1 }
 0x6bf   : > { %1566 = dma.done.wait (%p1349_p4), %s1132_s10, 128  }
 0x6c0   : > { %1568 = vsyncadd (%p1349_p4), %s1132_s10, 4294967168  ;;  %s2181_s14 = sld [smem:[#allocation9_spill]]  ;;  %p1351_p2 = pnand %p1354_p0, %p1826_p13 }
 0x6c2   : > { %p1352_p5 = pneg %p1351_p2 }
 0x6c6   : > { %s1141_s23 = sand.u32 1, %s2181_s14  }
 0x6c7   : > { %s1142_s28 = scalar_lea.sflag [#allocation6], %s1141_s23 }
 0x6c8   : > { %1570 = dma.done.wait (%p1352_p5), %s1142_s28, 128  }
 0x6c9   : > { %1572 = vsyncadd (%p1352_p5), %s1142_s28, 4294967168  ;;  %s35_s2 = sadd.s32 1, %s2178_s16   ;;  %s2183_s27 = sld [smem:[#allocation10_spill]] }
 0x6ca   : > { %p32_p12 = scmp.ge.s32.totalorder %s35_s2, 10   ;;  %s2184_s28 = sld [smem:[#allocation11_spill]] }
 0x6cb   : > { %s2185_s29 = sld [smem:[#allocation25_spill]] }
 0x6cc   : > { %s2186_s30 = sld [smem:[#allocation13_spill]] }
 0x6cd   : > { %s2187_s0 = sld [smem:[#allocation14_spill]] }
 0x6ce   : > { %s2188_s19 = sld [smem:[#allocation24_spill]]  ;;  %34 = sbr.rel (!%p32_p12) target bundleno = 23 (0x17), region = 170 }
 0x6cf   : > { %s2189_s1 = sld [smem:[#allocation16_spill]] }
 0x6d0   : > { %s2190_s20 = sld [smem:[#allocation17_spill]] }
 0x6d1   : > { %s2191_s21 = sld [smem:[#allocation19_spill]] }
 0x6d2   : > { %s2192_s22 = sld [smem:[#allocation21_spill]] }
 0x6d3   :  { %1148 = vsyncpa [#allocation4], 1 }
 0x6d4   :  { %1150 = vsyncpa [#allocation4 + $0x1], 1 }
 0x6d5   :  { %1151 = vsyncpa [#allocation6], 1 }
 0x6d6   :  { %1153 = vsyncpa [#allocation6 + $0x1], 1 }

</bundles_post_ra>
